<compile_context>
chip_gen: v7x
topology: tpu7x:2x2x1
jax: 0.10.0
libtpu: 0.0.40
codegen_flags: <defaults>
</compile_context>

<pallas_src>
import jax
import jax.numpy as jnp
from jax.experimental import pallas as pl
from jax.experimental.pallas import tpu as pltpu

LANE = 128  # TPU vreg lane width; pad feature dims to this for unmasked stores.


# ----------------------------- Pallas kernel -------------------------------

def gcn_fused_kernel(adj_ref, xw1_ref, b1_ref, w2_ref, b2_ref, out_ref):
    """Both GCN layers fused: out = relu(A @ relu(A @ XW1 + b1) @ W2 + b2)."""
    adj = adj_ref[...]                                   # (N, N) f32
    # ---- layer 1: aggregation + bias + ReLU (X @ W1 pre-folded on host) ----
    h = jnp.dot(adj, xw1_ref[...], preferred_element_type=jnp.float32)
    h = jnp.maximum(h + b1_ref[...], 0.0)                # (N, 128), padded cols stay 0
    # ---- layer 2: feature transform + aggregation + bias + ReLU ------------
    hw2 = jnp.dot(h, w2_ref[...], preferred_element_type=jnp.float32)
    out = jnp.dot(adj, hw2, preferred_element_type=jnp.float32)
    out_ref[...] = jnp.maximum(out + b2_ref[...], 0.0)   # (N, 128) lane-dense store


def gcn_forward_fused(adj, xw1_pad, b1_pad, w2_pad, b2_pad):
    n = adj.shape[0]
    vmem_spec = pl.BlockSpec(memory_space=pltpu.MemorySpace.VMEM)
    return pl.pallas_call(
        gcn_fused_kernel,
        out_shape=jax.ShapeDtypeStruct((n, LANE), jnp.float32),
        in_specs=[vmem_spec] * 5,
        out_specs=vmem_spec,
    )(adj, xw1_pad, b1_pad, w2_pad, b2_pad)


# ------------------------------ glue (JAX) ---------------------------------

def build_normalized_adjacency(edge_index, num_nodes):
    """Dense A_hat = D^{-1/2}(A + I)D^{-1/2}, PyG direction (src -> dst)."""
    src, dst = edge_index[0], edge_index[1]
    a = jnp.zeros((num_nodes, num_nodes), dtype=jnp.float32)
    # PyG GCNConv: out[dst] aggregates messages from x[src]  =>  A[dst, src] = 1
    a = a.at[dst, src].set(1.0)
    a = a + jnp.eye(num_nodes, dtype=jnp.float32)        # add self-loops
    a = jnp.minimum(a, 1.0)                              # dedupe edges
    deg = jnp.sum(a, axis=1)                             # in-degree (+ self-loop)
    dinv = jnp.where(deg > 0, 1.0 / jnp.sqrt(deg), 0.0)
    return dinv[:, None] * a * dinv[None, :]


def xavier_uniform(key, shape):
    fan_out, fan_in = shape[0], shape[1]
    bound = jnp.sqrt(6.0 / (fan_in + fan_out))
    return jax.random.uniform(key, shape, jnp.float32, -bound, bound)


def _pad_last(x, target):
    pad = target - x.shape[-1]
    if pad <= 0:
        return x
    return jnp.pad(x, [(0, 0)] * (x.ndim - 1) + [(0, pad)])


class GCNPallas:
    def __init__(self, edge_index, type_num, rel_num, emb_dim, dim1, dim2, key):
        self.type_num = type_num
        self.dim2 = dim2
        num_nodes = type_num + rel_num

        k0, k1, k2 = jax.random.split(key, 3)
        # nn.Embedding(type_num+rel_num, emb_dim).weight, xavier_uniform_
        node_embedding = xavier_uniform(k0, (num_nodes, emb_dim))
        # GCNConv weights (in, out), xavier_uniform_; biases zeros
        w1 = xavier_uniform(k1, (emb_dim, dim1))
        b1 = jnp.zeros((dim1,), jnp.float32)
        w2 = xavier_uniform(k2, (dim1, dim2))
        b2 = jnp.zeros((dim2,), jnp.float32)

        # --- constants hoisted out of the hot path (built once, f32, padded) ---
        self.adj = build_normalized_adjacency(edge_index, num_nodes)        # (N, N)
        # Constant-fold the first-layer feature transform X @ W1.
        self.xw1_pad = _pad_last(node_embedding @ w1, LANE)                 # (N, 128)
        self.b1_pad = _pad_last(b1.reshape(1, dim1), LANE)                  # (1, 128)
        w2_pad = _pad_last(w2, LANE)                                        # (dim1, 128)
        self.w2_pad = jnp.pad(w2_pad, ((0, LANE - dim1), (0, 0)))           # (128, 128)
        self.b2_pad = _pad_last(b2.reshape(1, dim2), LANE)                  # (1, 128)

    def forward(self):
        out_pad = gcn_forward_fused(self.adj, self.xw1_pad, self.b1_pad,
                                    self.w2_pad, self.b2_pad)               # (N, 128)
        out = out_pad[:, : self.dim2]                                       # (N, dim2)
        type_emb = out[: self.type_num]
        rel_emb = out[self.type_num:]
        return type_emb, rel_emb


# --------------------------------- main -------------------------------------

if __name__ == "__main__":
    key = jax.random.PRNGKey(0)

    type_num, rel_num = 6, 2
    emb_dim, dim1, dim2 = 32, 32, 16
    num_nodes = type_num + rel_num

    # deterministic small edge list: a ring over all nodes + a few type<->rel edges
    src = list(range(num_nodes)) + [0, 1, 2, 7]
    dst = [(i + 1) % num_nodes for i in range(num_nodes)] + [6, 7, 6, 3]
    edge_index = jnp.array([src, dst], dtype=jnp.int32)

    model = GCNPallas(edge_index, type_num, rel_num, emb_dim, dim1, dim2, key)
    type_emb, rel_emb = model.forward()
    jax.block_until_ready((type_emb, rel_emb))

    assert type_emb.shape == (type_num, dim2)
    assert rel_emb.shape == (rel_num, dim2)
    assert bool(jnp.all(jnp.isfinite(type_emb))) and bool(jnp.all(jnp.isfinite(rel_emb)))
    print("KERNEL_OK")
</pallas_src>

<mosaic_0001>
module attributes {stable_mosaic.version = 11 : i64} {
  func.func @gcn_fused_kernel(%arg0: memref<8x8xf32, #tpu.memory_space<vmem>>, %arg1: memref<8x128xf32, #tpu.memory_space<vmem>>, %arg2: memref<1x128xf32, #tpu.memory_space<vmem>>, %arg3: memref<128x128xf32, #tpu.memory_space<vmem>>, %arg4: memref<1x128xf32, #tpu.memory_space<vmem>>, %arg5: memref<8x128xf32, #tpu.memory_space<vmem>>) attributes {dimension_semantics = [], scalar_prefetch = 0 : i64, scratch_operands = 0 : i64, tpu.core_type = #tpu.core_type<tc>} {
    %c0 = arith.constant 0 : index
    %c0_0 = arith.constant 0 : index
    %0 = vector.load %arg0[%c0, %c0_0] : memref<8x8xf32, #tpu.memory_space<vmem>>, vector<8x8xf32>
    %c0_1 = arith.constant 0 : index
    %c0_2 = arith.constant 0 : index
    %1 = vector.load %arg1[%c0_1, %c0_2] : memref<8x128xf32, #tpu.memory_space<vmem>>, vector<8x128xf32>
    %cst = arith.constant dense<0.000000e+00> : vector<8x128xf32>
    %2 = tpu.matmul %0, %1, %cst {dimension_numbers = #tpu.dot_dimension_numbers<[1], [0], [0], [1], [0, 0, 1, 1], [], []>} : vector<8x8xf32>, vector<8x128xf32>, vector<8x128xf32> -> vector<8x128xf32>
    %c0_3 = arith.constant 0 : index
    %c0_4 = arith.constant 0 : index
    %3 = vector.load %arg2[%c0_3, %c0_4] : memref<1x128xf32, #tpu.memory_space<vmem>>, vector<1x128xf32>
    %4 = vector.broadcast %3 : vector<1x128xf32> to vector<8x128xf32>
    %5 = arith.addf %2, %4 : vector<8x128xf32>
    %cst_5 = arith.constant 0.000000e+00 : f32
    %6 = vector.broadcast %cst_5 : f32 to vector<8x128xf32>
    %7 = arith.maximumf %5, %6 : vector<8x128xf32>
    %c0_6 = arith.constant 0 : index
    %c0_7 = arith.constant 0 : index
    %8 = vector.load %arg3[%c0_6, %c0_7] : memref<128x128xf32, #tpu.memory_space<vmem>>, vector<128x128xf32>
    %cst_8 = arith.constant dense<0.000000e+00> : vector<8x128xf32>
    %9 = tpu.matmul %7, %8, %cst_8 {dimension_numbers = #tpu.dot_dimension_numbers<[1], [0], [0], [1], [0, 0, 1, 1], [], []>} : vector<8x128xf32>, vector<128x128xf32>, vector<8x128xf32> -> vector<8x128xf32>
    %cst_9 = arith.constant dense<0.000000e+00> : vector<8x128xf32>
    %10 = tpu.matmul %0, %9, %cst_9 {dimension_numbers = #tpu.dot_dimension_numbers<[1], [0], [0], [1], [0, 0, 1, 1], [], []>} : vector<8x8xf32>, vector<8x128xf32>, vector<8x128xf32> -> vector<8x128xf32>
    %c0_10 = arith.constant 0 : index
    %c0_11 = arith.constant 0 : index
    %11 = vector.load %arg4[%c0_10, %c0_11] : memref<1x128xf32, #tpu.memory_space<vmem>>, vector<1x128xf32>
    %12 = vector.broadcast %11 : vector<1x128xf32> to vector<8x128xf32>
    %13 = arith.addf %10, %12 : vector<8x128xf32>
    %cst_12 = arith.constant 0.000000e+00 : f32
    %14 = vector.broadcast %cst_12 : f32 to vector<8x128xf32>
    %15 = arith.maximumf %13, %14 : vector<8x128xf32>
    %c0_13 = arith.constant 0 : index
    %c0_14 = arith.constant 0 : index
    %16 = vector.load %arg5[%c0_13, %c0_14] : memref<8x128xf32, #tpu.memory_space<vmem>>, vector<8x128xf32>
    tpu.vector_store %arg5[%c0_13, %c0_14], %15 {strides = array<i32>} : memref<8x128xf32, #tpu.memory_space<vmem>>, vector<8x128xf32>,
    return
  }
}

</mosaic_0001>

<bundles_post_ra>
// kernel: tpu_custom_call.1
= control target key start
LH: loop header
LB: loop body
LE: loop exit
PB: predicated region body
PF: predicated region fallthrough
CT: control target
= control target key end

     0   :  { %10 = vsyncpa [#allocation3], 0  ;;  %s618_s0 = inlined_call_operand.hbm [shape: f32[8,8], index: 0, kind: input, shape index: {}]   ;;  %s619_s1 = inlined_call_operand.hbm [shape: f32[8,128], index: 1, kind: input, shape index: {}]   ;;  %s620_s2 = inlined_call_operand.vmem [shape: f32[1,128], index: 2, kind: input, shape index: {}]   ;;  %s621_s3 = inlined_call_operand.hbm [shape: f32[128,128], index: 3, kind: input, shape index: {}]   ;;  %s622_s4 = inlined_call_operand.vmem [shape: f32[1,128], index: 4, kind: input, shape index: {}]   ;;  %s623_s5 = inlined_call_operand.hbm [shape: f32[8,128], index: 5, kind: output, shape index: {}]  }
   0x1   :  { %11 = vsyncpa [#allocation6], 0 }
   0x2   :  { %12 = vsyncpa [#allocation4], 0  ;;  %s520_s18 = smov [#allocation5]   ;;  %s521_s20 = smov [#allocation2]  }
   0x3   :  { %s29_s19 = sshll.u32 %s520_s18, 4  ;;  %s19_s21 = sshll.u32 %s521_s20, 4  ;;  %s30_s19 = int_to_ptr.vmem [resolvable:$true] %s29_s19  ;;  %s20_s21 = int_to_ptr.vmem [resolvable:$true] %s19_s21 }
   0x4   :  { %s426_s24 = scalar_lea.hbm %s619_s1, 128 }
   0x5   :  { %p427_p0 = scmp.ne.s32.totalorder %s619_s1, %s426_s24  ;;  %p430_p1 = scmp.lt.u32.totalorder %s426_s24, %s619_s1 }
   0x7   :  { %p432_p2 = pnand %p430_p1, %p427_p0 }
   0x9   :  { %435 = shalt.err (!%p432_p2)
}
   0xa   :  { %s436_s29 = scalar_lea.vmem %s30_s19, 128  ;;  %p441_p4 = scmp.lt.s32.totalorder %s30_s19, %s30_s19 }
   0xb   :  { %p437_p3 = scmp.ne.s32.totalorder %s30_s19, %s436_s29  ;;  %p442_p5 = scmp.lt.s32.totalorder %s436_s29, %s436_s29 }
   0xd   :  { %p443_p6 = por %p442_p5, %p441_p4 }
   0xf   :  { %p444_p7 = pnand %p443_p6, %p437_p3 }
  0x11   :  { %447 = shalt.err (!%p444_p7)
}
  0x12   :  { %32 = dma.hbm_to_vmem [thread:$0]  %s619_s1, 128, %s30_s19, [#allocation6]  }
  0x13   :  { %s448_s9 = scalar_lea.hbm %s618_s0, 128 }
  0x14   :  { %p449_p8 = scmp.ne.s32.totalorder %s618_s0, %s448_s9  ;;  %p452_p9 = scmp.lt.u32.totalorder %s448_s9, %s618_s0 }
  0x16   :  { %p454_p10 = pnand %p452_p9, %p449_p8 }
  0x18   :  { %457 = shalt.err (!%p454_p10)
}
  0x19   :  { %s458_s14 = scalar_lea.vmem %s20_s21, 128  ;;  %p463_p12 = scmp.lt.s32.totalorder %s20_s21, %s20_s21 }
  0x1a   :  { %p459_p11 = scmp.ne.s32.totalorder %s20_s21, %s458_s14  ;;  %p464_p13 = scmp.lt.s32.totalorder %s458_s14, %s458_s14 }
  0x1c   :  { %p465_p0 = por %p464_p13, %p463_p12 }
  0x1e   :  { %p466_p1 = pnand %p465_p0, %p459_p11 }
  0x20   :  { %469 = shalt.err (!%p466_p1)
}
  0x21   :  { %22 = dma.hbm_to_vmem [thread:$0]  %s618_s0, 128, %s20_s21, [#allocation3]  }
  0x22   :  { %s522_s16 = smov [#allocation7]   ;;  %s470_s20 = scalar_lea.hbm %s621_s3, 2048 }
  0x23   :  { %s40_s17 = sshll.u32 %s522_s16, 4  ;;  %p471_p2 = scmp.ne.s32.totalorder %s621_s3, %s470_s20  ;;  %s41_s17 = int_to_ptr.vmem [resolvable:$true] %s40_s17 }
  0x24   :  { %p474_p3 = scmp.lt.u32.totalorder %s470_s20, %s621_s3 }
  0x26   :  { %p476_p4 = pnand %p474_p3, %p471_p2 }
  0x28   :  { %479 = shalt.err (!%p476_p4)
}
  0x29   :  { %s480_s26 = scalar_lea.vmem %s41_s17, 2048  ;;  %p485_p6 = scmp.lt.s32.totalorder %s41_s17, %s41_s17 }
  0x2a   :  { %p481_p5 = scmp.ne.s32.totalorder %s41_s17, %s480_s26  ;;  %p486_p7 = scmp.lt.s32.totalorder %s480_s26, %s480_s26 }
  0x2c   :  { %p487_p8 = por %p486_p7, %p485_p6 }
  0x2e   :  { %p488_p9 = pnand %p487_p8, %p481_p5 }
  0x30   :  { %491 = shalt.err (!%p488_p9)
}
  0x31   :  { %s523_s0 = smov 128   ;;  %s524_s21 = smov 8  }
  0x32   :  { %46 = dma.hbm_to_vmem [thread:$0]  %s621_s3, 2048, %s41_s17, [#allocation6], %s523_s0, %s523_s0, %s524_s21  }
  0x33   :  { %514 = dma.done.wait [#allocation3], 128  }
  0x34   :  { %515 = vsyncadd [#allocation3], 4294967168 }
  0x35   :  { %516 = dma.done.wait [#allocation6], 2176  }
  0x36   :  { %517 = vsyncadd [#allocation6], 4294965120  ;;  %v525_v0 = vmov 0.0   ;;  %vm526_vm0 = vmmov 0   ;;  %v527_v1 = vmov 0.0|0.0   ;;  %vm67_vm1 = vcmask 64512  }
  0x37   :  { %348 = vmatprep.subr.mxu0 %v525_v0  ;;  %350 = vmatprep.mubr.msk.f32.mxu0 %vm526_vm0, %v525_v0  ;;  %v59_v2 = vld [vmem:[#allocation5] sm:$0xff]  ;;  %v58_v3 = vld [vmem:[#allocation2] sm:$0xff]  ;;  %v142_v4 = vld [vmem:[#allocation7] sm:$0xff]  ;;  %s528_s7 = smov [#allocation8]  }
  0x38   :  { %393 = vmatprep.subr.bf16.mxu1 %v527_v1  ;;  %385 = vmatprep.mubr.msk.f32.mxu1 %vm526_vm0, %v525_v0  ;;  %v143_v5 = vld [vmem:[#allocation7 + $0x8] sm:$0xff]  ;;  %v144_v6 = vld [vmem:[#allocation7 + $0x10] sm:$0xff]  ;;  %v145_v7 = vld [vmem:[#allocation7 + $0x18] sm:$0xff]  ;;  %s313_s8 = sshll.u32 %s528_s7, 4  ;;  %s314_s8 = int_to_ptr.vmem [resolvable:$true] %s313_s8 }
  0x39   :  { %349 = vmatpush3.msra.mxu0 %v59_v2  ;;  %v394_v8 = vpack.c.bf16 %v143_v5, %v142_v4  ;;  %v397_v9 = vpack.c.bf16 %v145_v7, %v144_v6  ;;  %v146_v10 = vld [vmem:[#allocation7 + $0x20] sm:$0xff]  ;;  %v147_v11 = vld [vmem:[#allocation7 + $0x28] sm:$0xff]  ;;  %v148_v13 = vld [vmem:[#allocation7 + $0x30] sm:$0xff]  ;;  %p497_p11 = scmp.lt.s32.totalorder %s314_s8, %s314_s8 }
  0x3a   :  { %351 = vmatmul.mubr.msk.f32.vlgmr.msra.gmra.mrb[0].mxu0 %vm67_vm1, %v58_v3  ;;  %388 = vmatprep.subr.mxu0 %v525_v0  ;;  %v400_v12 = vpack.c.bf16 %v147_v11, %v146_v10  ;;  %v149_v14 = vld [vmem:[#allocation7 + $0x38] sm:$0xff]  ;;  %v150_v16 = vld [vmem:[#allocation7 + $0x40] sm:$0xff]  ;;  %v151_v17 = vld [vmem:[#allocation7 + $0x48] sm:$0xff] }
  0x3b   :  { %390 = vmatprep.mubr.msk.f32.mxu0 %vm526_vm0, %v525_v0  ;;  %395 = vmatpush3.bf16.msra.mxu1 %v394_v8  ;;  %v403_v15 = vpack.c.bf16 %v149_v14, %v148_v13  ;;  %v406_v18 = vpack.c.bf16 %v151_v17, %v150_v16  ;;  %v152_v19 = vld [vmem:[#allocation7 + $0x50] sm:$0xff]  ;;  %v153_v20 = vld [vmem:[#allocation7 + $0x58] sm:$0xff]  ;;  %v154_v22 = vld [vmem:[#allocation7 + $0x60] sm:$0xff] }
  0x3c   :  { %396 = vmatprep.subr.bf16.mxu1 %v527_v1  ;;  %v409_v21 = vpack.c.bf16 %v153_v20, %v152_v19  ;;  %v155_v23 = vld [vmem:[#allocation7 + $0x68] sm:$0xff]  ;;  %v156_v25 = vld [vmem:[#allocation7 + $0x70] sm:$0xff]  ;;  %v157_v26 = vld [vmem:[#allocation7 + $0x78] sm:$0xff] }
  0x3d   :  { %v412_v24 = vpack.c.bf16 %v155_v23, %v154_v22  ;;  %v415_v27 = vpack.c.bf16 %v157_v26, %v156_v25  ;;  %v323_v28 = vld [vmem:[%s620_s2] ss:$0 sm:$0xff]  ;;  %s492_s2 = scalar_lea.vmem %s314_s8, 128 }
  0x3e   :  { %v325_v35 = vld [vmem:[%s622_s4] ss:$0 sm:$0xff]  ;;  %p493_p10 = scmp.ne.s32.totalorder %s314_s8, %s492_s2  ;;  %p498_p12 = scmp.lt.s32.totalorder %s492_s2, %s492_s2 }
  0x3f   :  { %398 = vmatpush3.bf16.msra.mxu1 %v397_v9 }
  0x40   :  { %399 = vmatprep.subr.bf16.mxu1 %v527_v1  ;;  %p499_p13 = por %p498_p12, %p497_p11 }
  0x42   :  { %p500_p0 = pnand %p499_p13, %p493_p10 }
  0x43   :  { %401 = vmatpush3.bf16.msra.mxu1 %v400_v12 }
  0x44   :  { %402 = vmatprep.subr.bf16.mxu1 %v527_v1 }
  0x47   :  { %404 = vmatpush3.bf16.msra.mxu1 %v403_v15 }
  0x48   :  { %405 = vmatprep.subr.bf16.mxu1 %v527_v1 }
  0x4b   :  { %407 = vmatpush3.bf16.msra.mxu1 %v406_v18 }
  0x4c   :  { %408 = vmatprep.subr.bf16.mxu1 %v527_v1 }
  0x4f   :  { %410 = vmatpush3.bf16.msra.mxu1 %v409_v21 }
  0x50   :  { %411 = vmatprep.subr.bf16.mxu1 %v527_v1 }
  0x53   :  { %413 = vmatpush3.bf16.msra.mxu1 %v412_v24 }
  0x54   :  { %414 = vmatprep.subr.bf16.mxu1 %v527_v1 }
  0x57   :  { %416 = vmatpush3.bf16.msra.mxu1 %v415_v27 }
 0x10d   :  { %v137_v29 = vpop.f32.mrb[0].mxu0 }
 0x10e   :  { %v138_v30 = vadd.f32 %v323_v28, %v137_v29  ;;  %v352_v31 = vpop.f32.mrb[1].mxu0 }
 0x110   :  { %v141_v32 = vmax.f32 %v138_v30, 0.0 }
 0x112   :  { %386 = vmatmul.mubr.f32.vlgmr.msra.gmra.mrb[0].mxu1 %v141_v32 }
 0x1e5   :  { %v224_v33 = vpop.f32.mrb[0].mxu1 }
 0x1e6   :  { %v387_v34 = vpop.f32.mrb[1].mxu1  ;;  %389 = vmatpush3.msra.mxu0 %v224_v33 }
 0x1e7   :  { %391 = vmatmul.mubr.msk.f32.vlgmr.msra.gmra.mrb[2].mxu0 %vm67_vm1, %v58_v3 }
 0x2ba   :  { %v301_v36 = vpop.f32.mrb[2].mxu0 }
 0x2bb   :  { %v302_v37 = vadd.f32 %v325_v35, %v301_v36  ;;  %v392_v38 = vpop.f32.mrb[3].mxu0 }
 0x2bd   :  { %v305_v39 = vmax.f32 %v302_v37, 0.0 }
 0x2bf   :  { %306 = vst [vmem:[#allocation8] sm:$0xff] %v305_v39 }
 0x2c0   :  { %503 = shalt.err (!%p500_p0)
}
 0x2c1   :  { %s504_s11 = scalar_lea.hbm %s623_s5, 128 }
 0x2c2   :  { %p505_p1 = scmp.ne.s32.totalorder %s623_s5, %s504_s11  ;;  %p508_p2 = scmp.lt.u32.totalorder %s504_s11, %s623_s5 }
 0x2c4   :  { %p510_p3 = pnand %p508_p2, %p505_p1 }
 0x2c6   :  { %513 = shalt.err (!%p510_p3)
}
 0x2c7   :  { %316 = dma.vmem_to_hbm [thread:$0]  %s314_s8, 128, %s623_s5, [#allocation4]  }
 0x2c8   :  { %518 = dma.done.wait [#allocation4], 128  }
 0x2c9   :  { %519 = vsyncadd [#allocation4], 4294967168 }
 0x2ca   :  { %320 = vsyncpa [#allocation3], 1 }
 0x2cb   :  { %321 = vsyncpa [#allocation6], 1 }
 0x2cc   :  { %322 = vsyncpa [#allocation4], 1 }

</bundles_post_ra>
